<compile_context>
chip_gen: v7x
topology: tpu7x:2x2x1
jax: 0.10.0
libtpu: 0.0.40
codegen_flags: <defaults>
</compile_context>

<pallas_src>
import math

import jax
import jax.numpy as jnp
from jax import lax
from jax.experimental import pallas as pl
from jax.experimental.pallas import tpu as pltpu


# ----------------------------------------------------------------------------
# Generation-aware VMEM limit (leave headroom below the physical capacity).
# ----------------------------------------------------------------------------
def _vmem_limit_bytes():
    try:
        cap = pltpu.get_tpu_info().vmem_capacity_bytes
        return int(cap * 3 // 4)
    except Exception:
        return 48 * 1024 * 1024  # conservative cross-generation fallback


def _pick_row_tile(rows, target=512):
    """Largest row tile dividing `rows`, sublane aligned (x8), <= target."""
    if rows <= target:
        return rows
    for t in range(target - target % 8, 7, -8):
        if rows % t == 0:
            return t
    return rows


def _pick_seq_tile(n, target, align):
    """Largest tile dividing n that is a multiple of `align` and <= target."""
    if n <= target:
        return n
    t = target - target % align
    while t >= align:
        if n % t == 0:
            return t
        t -= align
    return n


# ----------------------------------------------------------------------------
# Kernel 1: RMSNorm + fused QKV projection (1/sqrt(dim_head) folded into Wq).
# ----------------------------------------------------------------------------
def _norm_qkv_kernel(x_ref, gamma_ref, wqkv_ref, qkv_ref):
    xb = x_ref[...]                                        # (rt, dim) f32
    dim = xb.shape[-1]
    sq = jnp.sum(xb * xb, axis=-1, keepdims=True)
    inv = lax.rsqrt(jnp.maximum(sq, jnp.float32(1e-24)))
    xn = xb * inv * jnp.float32(math.sqrt(dim)) * gamma_ref[...]
    qkv_ref[...] = jnp.dot(
        xn.astype(jnp.bfloat16), wqkv_ref[...],
        preferred_element_type=jnp.float32).astype(qkv_ref.dtype)


# ----------------------------------------------------------------------------
# Kernel 2: flash attention with relative-position bias (online softmax).
# Grid: (batch, heads, q-blocks, kv-blocks); kv axis is the reduction axis.
# ----------------------------------------------------------------------------
def _flash_attn_kernel(q_ref, k_ref, v_ref, bias_ref, o_ref, m_sc, l_sc, acc_sc):
    ki = pl.program_id(3)

    @pl.when(ki == 0)
    def _():
        m_sc[...] = jnp.full(m_sc.shape, -jnp.inf, jnp.float32)
        l_sc[...] = jnp.zeros(l_sc.shape, jnp.float32)
        acc_sc[...] = jnp.zeros(acc_sc.shape, jnp.float32)

    q = q_ref[0, 0]                                        # (tq, dh) bf16 (pre-scaled)
    k = k_ref[0, 0]                                        # (tk, dh) bf16
    v = v_ref[0, 0]                                        # (tk, dh) bf16

    # scores + dynamic position bias (== float attn_mask in SDPA)
    s = lax.dot_general(q, k, (((1,), (1,)), ((), ())),
                        preferred_element_type=jnp.float32)       # (tq, tk)
    s = s + bias_ref[0].astype(jnp.float32)

    # online softmax update (f32 elementwise; no bf16 EUP on v5e)
    m_prev = m_sc[...]
    m_new = jnp.maximum(m_prev, jnp.max(s, axis=-1, keepdims=True))
    alpha = jnp.exp(m_prev - m_new)
    p = jnp.exp(s - m_new)
    l_sc[...] = alpha * l_sc[...] + jnp.sum(p, axis=-1, keepdims=True)
    acc_sc[...] = alpha * acc_sc[...] + jnp.dot(
        p.astype(jnp.bfloat16), v, preferred_element_type=jnp.float32)
    m_sc[...] = m_new

    @pl.when(ki == pl.num_programs(3) - 1)
    def _():
        inv_l = pl.reciprocal(l_sc[...], approx=True)
        o_ref[...] = (acc_sc[...] * inv_l).astype(o_ref.dtype).reshape(o_ref.shape)


# ----------------------------------------------------------------------------
# Kernel 3: fused output projection (single K=dim contraction) + bias.
# ----------------------------------------------------------------------------
def _out_proj_kernel(ctx_ref, wout_ref, bout_ref, y_ref):
    y = jnp.dot(ctx_ref[...], wout_ref[...], preferred_element_type=jnp.float32)
    y_ref[...] = (y + bout_ref[...]).astype(y_ref.dtype)


# ----------------------------------------------------------------------------
# DynamicPositionBias (depth=2, log_distance=False) -- tiny plain-JAX setup.
# ----------------------------------------------------------------------------
def dynamic_position_bias(n, p):
    pos = jnp.arange(-n + 1, n, dtype=jnp.float32)[:, None]       # (2n-1, 1)
    h = jax.nn.silu(pos @ p["dpb_w0"].T + p["dpb_b0"])            # (2n-1, pd)
    h = jax.nn.silu(h @ p["dpb_w1"].T + p["dpb_b1"])              # (2n-1, pd)
    out = h @ p["dpb_w2"].T + p["dpb_b2"]                         # (2n-1, heads)
    idx = (jnp.arange(n)[:, None] - jnp.arange(n)[None, :]) + n - 1
    bias = out[idx]                                               # (n, n, heads)
    return jnp.transpose(bias, (2, 0, 1)).astype(jnp.float32)     # (heads, n, n)


# ----------------------------------------------------------------------------
# Wrapper around the three pallas_calls.
# ----------------------------------------------------------------------------
def attention_forward(x, params, *, heads, dim_head):
    b, n, dim = x.shape
    assert dim == heads * dim_head
    rows = b * n
    scale = 1.0 / math.sqrt(dim_head)
    vmem = _vmem_limit_bytes()

    # --- wrapper-side weight prep (rides the existing casts, effectively free)
    # NOTE: weights are (in, out) -- transposed vs. PyTorch nn.Linear (out, in);
    # real checkpoints must be transposed before feeding this kernel.
    wqkv = params["wqkv"]
    wqkv = jnp.concatenate([wqkv[:, :dim] * scale, wqkv[:, dim:]], axis=-1)
    wqkv = wqkv.astype(jnp.bfloat16)                               # (dim, 3*dim)
    wout = params["wout"].astype(jnp.bfloat16)                     # (dim, dim)
    gamma = params["gamma"][None, :]                               # (1, dim) f32
    bout = params["bout"][None, :]                                 # (1, dim) f32
    bias = dynamic_position_bias(n, params).astype(jnp.bfloat16)   # (heads, n, n)

    # --- kernel 1: RMSNorm + fused QKV projection ---------------------------
    rt = _pick_row_tile(rows)
    x2 = x.reshape(rows, dim)
    qkv = pl.pallas_call(
        _norm_qkv_kernel,
        out_shape=jax.ShapeDtypeStruct((rows, 3 * dim), jnp.bfloat16),
        grid_spec=pltpu.PrefetchScalarGridSpec(
            num_scalar_prefetch=0,
            grid=(rows // rt,),
            in_specs=[
                pl.BlockSpec((rt, dim), lambda i: (i, 0)),            # x (f32)
                pl.BlockSpec((1, dim), lambda i: (0, 0)),             # gamma
                pl.BlockSpec((dim, 3 * dim), lambda i: (0, 0)),       # Wqkv (bf16)
            ],
            out_specs=pl.BlockSpec((rt, 3 * dim), lambda i: (i, 0)),
        ),
        compiler_params=pltpu.CompilerParams(
            dimension_semantics=("parallel",), vmem_limit_bytes=vmem),
    )(x2, gamma, wqkv)

    # layout plumbing (cheap wrapper-side XLA transposes):
    # (rows, 3*dim) -> q/k/v each (b, heads, n, dim_head) bf16
    qkv4 = qkv.reshape(b, n, 3, heads, dim_head)
    q = jnp.transpose(qkv4[:, :, 0], (0, 2, 1, 3))
    k = jnp.transpose(qkv4[:, :, 1], (0, 2, 1, 3))
    v = jnp.transpose(qkv4[:, :, 2], (0, 2, 1, 3))

    # --- kernel 2: flash attention + dynamic-position bias ------------------
    tq = _pick_seq_tile(n, 256, 8)
    tk = _pick_seq_tile(n, 512, 128)
    out = pl.pallas_call(
        _flash_attn_kernel,
        out_shape=jax.ShapeDtypeStruct((b, heads, n, dim_head), jnp.bfloat16),
        grid_spec=pltpu.PrefetchScalarGridSpec(
            num_scalar_prefetch=0,
            grid=(b, heads, n // tq, n // tk),
            in_specs=[
                pl.BlockSpec((1, 1, tq, dim_head),
                             lambda bi, hi, qi, ki: (bi, hi, qi, 0)),   # q
                pl.BlockSpec((1, 1, tk, dim_head),
                             lambda bi, hi, qi, ki: (bi, hi, ki, 0)),   # k
                pl.BlockSpec((1, 1, tk, dim_head),
                             lambda bi, hi, qi, ki: (bi, hi, ki, 0)),   # v
                pl.BlockSpec((1, tq, tk),
                             lambda bi, hi, qi, ki: (hi, qi, ki)),      # bias tile
            ],
            out_specs=pl.BlockSpec((1, 1, tq, dim_head),
                                   lambda bi, hi, qi, ki: (bi, hi, qi, 0)),
            scratch_shapes=[
                pltpu.VMEM((tq, 1), jnp.float32),          # running max
                pltpu.VMEM((tq, 1), jnp.float32),          # running denom
                pltpu.VMEM((tq, dim_head), jnp.float32),   # running acc
            ],
        ),
        compiler_params=pltpu.CompilerParams(
            dimension_semantics=("parallel", "parallel", "parallel", "arbitrary"),
            vmem_limit_bytes=vmem),
    )(q, k, v, bias)

    # --- kernel 3: fused output projection -----------------------------------
    ctx = jnp.transpose(out, (0, 2, 1, 3)).reshape(rows, dim)       # (rows, dim) bf16
    y = pl.pallas_call(
        _out_proj_kernel,
        out_shape=jax.ShapeDtypeStruct((rows, dim), jnp.float32),
        grid_spec=pltpu.PrefetchScalarGridSpec(
            num_scalar_prefetch=0,
            grid=(rows // rt,),
            in_specs=[
                pl.BlockSpec((rt, dim), lambda i: (i, 0)),            # ctx (bf16)
                pl.BlockSpec((dim, dim), lambda i: (0, 0)),           # Wout (bf16)
                pl.BlockSpec((1, dim), lambda i: (0, 0)),             # bout
            ],
            out_specs=pl.BlockSpec((rt, dim), lambda i: (i, 0)),
        ),
        compiler_params=pltpu.CompilerParams(
            dimension_semantics=("parallel",), vmem_limit_bytes=vmem),
    )(ctx, wout, bout)

    return y.reshape(b, n, dim)


# ----------------------------------------------------------------------------
# Plain-JAX f32 reference (for sanity check)
# ----------------------------------------------------------------------------
def reference(x, params, *, heads, dim_head):
    b, n, dim = x.shape
    sq = jnp.sum(x * x, axis=-1, keepdims=True)
    xn = x * jax.lax.rsqrt(jnp.maximum(sq, 1e-24)) * math.sqrt(dim) * params["gamma"]
    qkv = xn @ params["wqkv"]
    q, k, v = jnp.split(qkv, 3, axis=-1)
    to_h = lambda t: t.reshape(b, n, heads, dim_head).transpose(0, 2, 1, 3)
    q, k, v = map(to_h, (q, k, v))
    bias = dynamic_position_bias(n, params)
    s = jnp.einsum('bhnd,bhmd->bhnm', q, k) / math.sqrt(dim_head) + bias[None]
    p = jax.nn.softmax(s, axis=-1)
    o = jnp.einsum('bhnm,bhmd->bhnd', p, v)
    o = o.transpose(0, 2, 1, 3).reshape(b, n, dim)
    return o @ params["wout"] + params["bout"]


# ----------------------------------------------------------------------------
# Deterministic parameter init (shapes per Attention.__init__)
# ----------------------------------------------------------------------------
def init_params(key, dim, dim_head):
    heads = dim // dim_head
    pd = dim // 4                     # DynamicPositionBias hidden dim
    ks = jax.random.split(key, 8)
    std = 0.05
    # NOTE: the reference module zero-inits to_out when time_cond_dim is None;
    # here we use a deterministic random init so the output is non-trivial.
    return {
        "gamma":  jnp.ones((dim,), jnp.float32),                               # RMSNorm
        "wqkv":   jax.random.normal(ks[0], (dim, 3 * dim), jnp.float32) * std, # to_qkv (no bias)
        "wout":   jax.random.normal(ks[1], (dim, dim), jnp.float32) * std,     # to_out weight
        "bout":   jax.random.normal(ks[2], (dim,), jnp.float32) * std,         # to_out bias
        "dpb_w0": jax.random.normal(ks[3], (pd, 1), jnp.float32) * std,        # Linear(1, pd)
        "dpb_b0": jnp.zeros((pd,), jnp.float32),
        "dpb_w1": jax.random.normal(ks[4], (pd, pd), jnp.float32) * std,       # Linear(pd, pd)
        "dpb_b1": jnp.zeros((pd,), jnp.float32),
        "dpb_w2": jax.random.normal(ks[5], (heads, pd), jnp.float32) * std,    # Linear(pd, heads)
        "dpb_b2": jnp.zeros((heads,), jnp.float32),
    }


if __name__ == "__main__":
    batch, seq, dim, dim_head = 2, 16, 64, 32
    heads = dim // dim_head

    key = jax.random.PRNGKey(0)
    kx, kp = jax.random.split(key)
    x = jax.random.normal(kx, (batch, seq, dim), jnp.float32)
    params = init_params(kp, dim, dim_head)

    out = attention_forward(x, params, heads=heads, dim_head=dim_head)
    out = jax.block_until_ready(out)

    ref = jax.block_until_ready(reference(x, params, heads=heads, dim_head=dim_head))
    assert out.shape == (batch, seq, dim)
    # bf16 MXU inputs / bf16 inter-kernel intermediates + approx EUP reciprocal:
    # compare against the f32 reference with loosened tolerances.
    assert jnp.allclose(out, ref, rtol=2e-2, atol=2e-2), \
        f"max err {jnp.max(jnp.abs(out - ref))}"

    print("KERNEL_OK")
</pallas_src>

<mosaic_0001>
module attributes {stable_mosaic.version = 11 : i64} {
  func.func @_norm_qkv_kernel(%arg0: i32, %arg1: memref<32x64xf32, #tpu.memory_space<vmem>>, %arg2: memref<1x64xf32, #tpu.memory_space<vmem>>, %arg3: memref<64x192xbf16, #tpu.memory_space<vmem>>, %arg4: memref<32x192xbf16, #tpu.memory_space<vmem>>) attributes {dimension_semantics = [#tpu.dimension_semantics<parallel>], iteration_bounds = array<i64: 1>, scalar_prefetch = 0 : i64, scratch_operands = 0 : i64, tpu.core_type = #tpu.core_type<tc>, window_params = [{transform_indices = @transform_0, window_bounds = array<i64: 32, 64>}, {pipeline_mode = #tpu.pipeline_mode<synchronous>, transform_indices = @transform_1, window_bounds = array<i64: 1, 64>}, {pipeline_mode = #tpu.pipeline_mode<synchronous>, transform_indices = @transform_2, window_bounds = array<i64: 64, 192>}, {transform_indices = @transform_3, window_bounds = array<i64: 32, 192>}]} {
    %c0 = arith.constant 0 : index
    %c0_0 = arith.constant 0 : index
    %0 = vector.load %arg1[%c0, %c0_0] : memref<32x64xf32, #tpu.memory_space<vmem>>, vector<32x64xf32>
    %1 = arith.mulf %0, %0 : vector<32x64xf32>
    %cst = arith.constant dense<0.000000e+00> : vector<32xf32>
    %2 = vector.multi_reduction <add>, %1, %cst [1] : vector<32x64xf32> to vector<32xf32>
    %3 = vector.shape_cast %2 : vector<32xf32> to vector<32x1xf32>
    %cst_1 = arith.constant 1.000000e-24 : f32
    %4 = vector.broadcast %cst_1 : f32 to vector<32x1xf32>
    %5 = arith.maximumf %3, %4 : vector<32x1xf32>
    %6 = math.rsqrt %5 : vector<32x1xf32>
    %7 = vector.broadcast %6 : vector<32x1xf32> to vector<32x64xf32>
    %8 = arith.mulf %0, %7 : vector<32x64xf32>
    %cst_2 = arith.constant 8.000000e+00 : f32
    %9 = vector.broadcast %cst_2 : f32 to vector<32x64xf32>
    %10 = arith.mulf %8, %9 : vector<32x64xf32>
    %c0_3 = arith.constant 0 : index
    %c0_4 = arith.constant 0 : index
    %11 = vector.load %arg2[%c0_3, %c0_4] : memref<1x64xf32, #tpu.memory_space<vmem>>, vector<1x64xf32>
    %12 = vector.broadcast %11 : vector<1x64xf32> to vector<32x64xf32>
    %13 = arith.mulf %10, %12 : vector<32x64xf32>
    %14 = arith.truncf %13 : vector<32x64xf32> to vector<32x64xbf16>
    %c0_5 = arith.constant 0 : index
    %c0_6 = arith.constant 0 : index
    %15 = vector.load %arg3[%c0_5, %c0_6] : memref<64x192xbf16, #tpu.memory_space<vmem>>, vector<64x192xbf16>
    %cst_7 = arith.constant dense<0.000000e+00> : vector<32x192xf32>
    %16 = tpu.matmul %14, %15, %cst_7 {dimension_numbers = #tpu.dot_dimension_numbers<[1], [0], [0], [1], [0, 0, 1, 1], [], []>} : vector<32x64xbf16>, vector<64x192xbf16>, vector<32x192xf32> -> vector<32x192xf32>
    %17 = arith.truncf %16 : vector<32x192xf32> to vector<32x192xbf16>
    %c0_8 = arith.constant 0 : index
    %c0_9 = arith.constant 0 : index
    %18 = vector.load %arg4[%c0_8, %c0_9] : memref<32x192xbf16, #tpu.memory_space<vmem>>, vector<32x192xbf16>
    tpu.vector_store %arg4[%c0_8, %c0_9], %17 {strides = array<i32>} : memref<32x192xbf16, #tpu.memory_space<vmem>>, vector<32x192xbf16>,
    return
  }
  func.func @transform_0(%arg0: i32) -> (i32, i32) {
    %c0_i32 = arith.constant 0 : i32
    %c0_i32_0 = arith.constant 0 : i32
    return %arg0, %c0_i32 : i32, i32
  }
  func.func @transform_1(%arg0: i32) -> (i32, i32) {
    %c0_i32 = arith.constant 0 : i32
    %c0_i32_0 = arith.constant 0 : i32
    %c0_i32_1 = arith.constant 0 : i32
    return %c0_i32, %c0_i32_0 : i32, i32
  }
  func.func @transform_2(%arg0: i32) -> (i32, i32) {
    %c0_i32 = arith.constant 0 : i32
    %c0_i32_0 = arith.constant 0 : i32
    %c0_i32_1 = arith.constant 0 : i32
    return %c0_i32, %c0_i32_0 : i32, i32
  }
  func.func @transform_3(%arg0: i32) -> (i32, i32) {
    %c0_i32 = arith.constant 0 : i32
    %c0_i32_0 = arith.constant 0 : i32
    return %arg0, %c0_i32 : i32, i32
  }
}

</mosaic_0001>

<bundles_post_ra>
// kernel: tpu_custom_call.1
= control target key start
LH: loop header
LB: loop body
LE: loop exit
PB: predicated region body
PF: predicated region fallthrough
CT: control target
= control target key end

     0   :  { %8 = vsyncpa [#allocation3], 0  ;;  %s467_s0 = inlined_call_operand.hbm [shape: f32[32,64], index: 0, kind: input, shape index: {}]   ;;  %s468_s1 = inlined_call_operand.vmem [shape: f32[1,64], index: 1, kind: input, shape index: {}]   ;;  %s469_s2 = inlined_call_operand.hbm [shape: bf16[64,192], index: 2, kind: input, shape index: {}]   ;;  %s470_s3 = inlined_call_operand.hbm [shape: bf16[32,192], index: 3, kind: output, shape index: {}]  }
   0x1   :  { %9 = vsyncpa [#allocation6], 0 }
   0x2   :  { %10 = vsyncpa [#allocation4], 0  ;;  %s375_s12 = smov [#allocation2]   ;;  %s303_s16 = scalar_lea.hbm %s467_s0, 512 }
   0x3   :  { %s16_s13 = sshll.u32 %s375_s12, 4  ;;  %p304_p0 = scmp.ne.s32.totalorder %s467_s0, %s303_s16  ;;  %s17_s13 = int_to_ptr.vmem [resolvable:$true] %s16_s13 }
   0x4   :  { %p307_p1 = scmp.lt.u32.totalorder %s303_s16, %s467_s0 }
   0x6   :  { %p309_p2 = pnand %p307_p1, %p304_p0 }
   0x8   :  { %312 = shalt.err (!%p309_p2)
}
   0x9   :  { %s313_s21 = scalar_lea.vmem %s17_s13, 512  ;;  %p318_p4 = scmp.lt.s32.totalorder %s17_s13, %s17_s13 }
   0xa   :  { %p314_p3 = scmp.ne.s32.totalorder %s17_s13, %s313_s21  ;;  %p319_p5 = scmp.lt.s32.totalorder %s313_s21, %s313_s21 }
   0xc   :  { %p320_p6 = por %p319_p5, %p318_p4 }
   0xe   :  { %p321_p7 = pnand %p320_p6, %p314_p3 }
  0x10   :  { %324 = shalt.err (!%p321_p7)
}
  0x11   :  { %s376_s22 = smov 128   ;;  %s377_s23 = smov 8  }
  0x12   :  { %22 = dma.hbm_to_vmem [thread:$0]  %s467_s0, 512, %s17_s13, [#allocation3], %s376_s22, %s376_s22, %s377_s23  }
  0x13   :  { %s378_s26 = smov [#allocation5]   ;;  %s325_s30 = scalar_lea.hbm %s469_s2, 1024 }
  0x14   :  { %s30_s27 = sshll.u32 %s378_s26, 4  ;;  %p326_p8 = scmp.ne.s32.totalorder %s469_s2, %s325_s30  ;;  %s31_s27 = int_to_ptr.vmem [resolvable:$true] %s30_s27 }
  0x15   :  { %p329_p9 = scmp.lt.u32.totalorder %s325_s30, %s469_s2 }
  0x17   :  { %p331_p10 = pnand %p329_p9, %p326_p8 }
  0x19   :  { %334 = shalt.err (!%p331_p10)
}
  0x1a   :  { %s335_s8 = scalar_lea.vmem %s31_s27, 1024  ;;  %p340_p12 = scmp.lt.s32.totalorder %s31_s27, %s31_s27 }
  0x1b   :  { %p336_p11 = scmp.ne.s32.totalorder %s31_s27, %s335_s8  ;;  %p341_p13 = scmp.lt.s32.totalorder %s335_s8, %s335_s8 }
  0x1d   :  { %p342_p0 = por %p341_p13, %p340_p12 }
  0x1f   :  { %p343_p1 = pnand %p342_p0, %p336_p11 }
  0x21   :  { %346 = shalt.err (!%p343_p1)
}
  0x22   :  { %36 = dma.hbm_to_vmem [thread:$0]  %s469_s2, 1024, %s31_s27, [#allocation6], %s376_s22, %s376_s22, %s377_s23  }
  0x23   :  { %369 = dma.done.wait [#allocation3], 512  }
  0x24   :  { %370 = vsyncadd [#allocation3], 4294966784 }
  0x25   :  { %371 = dma.done.wait [#allocation6], 1024  }
  0x26   :  { %372 = vsyncadd [#allocation6], 4294966272  ;;  %v46_v0 = vld [vmem:[#allocation2 + $0x10] sm:$0xff]  ;;  %vm52_vm0 = vcmask 523264   ;;  %v44_v1 = vld [vmem:[#allocation2] sm:$0xff]  ;;  %v379_v20 = vmov 0  }
  0x27   :  { %v47_v2 = vld [vmem:[#allocation2 + $0x18] sm:$0xff]  ;;  %v50_v3 = vmul.f32 %v46_v0, %v46_v0  ;;  %v48_v4 = vmul.f32 %v44_v1, %v44_v1  ;;  %v45_v6 = vld [vmem:[#allocation2 + $0x8] sm:$0xff]  ;;  %180 = vmatprep.mubr.bf16.mxu0 %v379_v20  ;;  %190 = vmatprep.mubr.bf16.mxu1 %v379_v20  ;;  %v250_v39 = vld [vmem:[%s468_s1] ss:$0 sm:$0xff]  ;;  %vm225_vm1 = vcmask 1043456   ;;  %vm226_vm2 = vcmask 523268  }
  0x28   :  { %v51_v5 = vmul.f32 %v47_v2, %v47_v2  ;;  %v49_v7 = vmul.f32 %v45_v6, %v45_v6  ;;  %v283_v12 = vld [vmem:[#allocation5 + $0x4] ss:$8 sps:$4 sm:$0xff]   ;;  %v285_v13 = vld [vmem:[#allocation5] ss:$8 sps:$4 sm:$0xff]   ;;  %v286_v14 = vld [vmem:[#allocation5 + $0x14] ss:$8 sps:$4 sm:$0xff]  }
  0x29   :  { %v59_v8 = vsel %vm52_vm0, %v50_v3, 0.0  ;;  %v53_v9 = vsel %vm52_vm0, %v48_v4, 0.0  ;;  %148 = vmatprep.subr.bf16.mxu0 %v283_v12  ;;  %269 = vmatprep.subr.bf16.mxu1 %v283_v12  ;;  %v288_v15 = vld [vmem:[#allocation5 + $0x10] ss:$8 sps:$4 sm:$0xff]   ;;  %v289_v16 = vld [vmem:[#allocation5 + $0x24] ss:$8 sps:$4 sm:$0xff]   ;;  %vm440_vm3 = vmor %vm226_vm2, %vm225_vm1 }
  0x2a   :  { %60 = vadd.xlane.f32.xlu1 %v59_v8  ;;  %54 = vadd.xlane.f32.xlu0 %v53_v9  ;;  %v62_v10 = vsel %vm52_vm0, %v51_v5, 0.0  ;;  %v56_v11 = vsel %vm52_vm0, %v49_v7, 0.0  ;;  %v291_v17 = vld [vmem:[#allocation5 + $0x20] ss:$8 sps:$4 sm:$0xff]   ;;  %v292_v18 = vld [vmem:[#allocation5 + $0x34] ss:$8 sps:$4 sm:$0xff]  }
  0x2b   :  { %149 = vmatpush1.bf16.msra.mxu0 %v285_v13  ;;  %273 = vmatpush1.bf16.msra.mxu1 %v285_v13  ;;  %v294_v19 = vld [vmem:[#allocation5 + $0x30] ss:$8 sps:$4 sm:$0xff]   ;;  %s380_s1 = smov [#allocation7]  }
  0x2c   :  { %150 = vmatprep.subr.bf16.mxu0 %v286_v14  ;;  %270 = vmatprep.subr.bf16.mxu1 %v286_v14  ;;  %s237_s11 = sshll.u32 %s380_s1, 4  ;;  %s238_s11 = int_to_ptr.vmem [resolvable:$true] %s237_s11 }
  0x2d   :  { %s347_s12 = scalar_lea.vmem %s238_s11, 512  ;;  %p352_p3 = scmp.lt.s32.totalorder %s238_s11, %s238_s11 }
  0x2e   :  { %63 = vadd.xlane.f32.xlu1 %v62_v10  ;;  %57 = vadd.xlane.f32.xlu0 %v56_v11  ;;  %p348_p2 = scmp.ne.s32.totalorder %s238_s11, %s347_s12  ;;  %p353_p4 = scmp.lt.s32.totalorder %s347_s12, %s347_s12 }
  0x2f   :  { %151 = vmatpush1.bf16.msra.mxu0 %v288_v15  ;;  %274 = vmatpush1.bf16.msra.mxu1 %v288_v15 }
  0x30   :  { %152 = vmatprep.subr.bf16.mxu0 %v289_v16  ;;  %271 = vmatprep.subr.bf16.mxu1 %v289_v16  ;;  %p354_p5 = por %p353_p4, %p352_p3 }
  0x32   :  { %p355_p6 = pnand %p354_p5, %p348_p2 }
  0x33   :  { %153 = vmatpush1.bf16.msra.mxu0 %v291_v17  ;;  %275 = vmatpush1.bf16.msra.mxu1 %v291_v17 }
  0x34   :  { %154 = vmatprep.subr.bf16.mxu0 %v292_v18  ;;  %272 = vmatprep.subr.bf16.mxu1 %v292_v18 }
  0x37   :  { %155 = vmatpush1.bf16.msra.mxu0 %v294_v19  ;;  %276 = vmatpush1.bf16.msra.mxu1 %v294_v19 }
  0xb7   :  { %v61_v21 = vpop.xlane.xlu1 %60  ;;  %v55_v22 = vpop.xlane.xlu0 %54 }
  0xb8   :  { %v67_v23 = vmax.f32 %v61_v21, 1e-24  ;;  %v65_v24 = vmax.f32 %v55_v22, 1e-24 }
  0xba   :  { %295 = vrsqrt.f32 %v67_v23 }
  0xbb   :  { %297 = vrsqrt.f32 %v65_v24  ;;  %v64_v25 = vpop.xlane.xlu1 %63  ;;  %v58_v26 = vpop.xlane.xlu0 %57 }
  0xbc   :  { %v68_v27 = vmax.f32 %v64_v25, 1e-24  ;;  %v66_v28 = vmax.f32 %v58_v26, 1e-24 }
  0xbe   :  { %299 = vrsqrt.f32 %v68_v27 }
  0xbf   :  { %301 = vrsqrt.f32 %v66_v28 }
  0xc4   :  { %v296_v29 = vpop.eup %295 }
  0xc5   :  { %v298_v30 = vpop.eup %297  ;;  %v75_v31 = vmul.f32 %v296_v29, %v46_v0 }
  0xc6   :  { %v73_v32 = vmul.f32 %v298_v30, %v44_v1 }
  0xc7   :  { %v79_v36 = vmul.f32 8.0, %v75_v31 }
  0xc8   :  { %v300_v33 = vpop.eup %299  ;;  %v77_v38 = vmul.f32 8.0, %v73_v32 }
  0xc9   :  { %v302_v34 = vpop.eup %301  ;;  %v76_v35 = vmul.f32 %v300_v33, %v47_v2  ;;  %v90_v42 = vmul.f32 %v250_v39, %v79_v36 }
  0xca   :  { %v74_v37 = vmul.f32 %v302_v34, %v45_v6  ;;  %v88_v44 = vmul.f32 %v250_v39, %v77_v38 }
  0xcb   :  { %v80_v40 = vmul.f32 8.0, %v76_v35 }
  0xcc   :  { %v78_v41 = vmul.f32 8.0, %v74_v37 }
  0xcd   :  { %v91_v43 = vmul.f32 %v250_v39, %v80_v40 }
  0xce   :  { %v89_v45 = vmul.f32 %v250_v39, %v78_v41 }
  0xcf   :  { %v93_v46 = vpack.c.bf16 %v91_v43, %v90_v42 }
  0xd0   :  { %v92_v47 = vpack.c.bf16 %v89_v45, %v88_v44 }
  0xd1   :  { %260 = vmatmul.mubr.msk.bf16.vlgmr.msra.gmra.mrb[0].mxu1 %vm52_vm0, %v93_v46 }
  0xd2   :  { %259 = vmatmul.mubr.msk.bf16.vlgmr.msra.gmra.mrb[0].mxu0 %vm52_vm0, %v92_v47 }
 0x1a4   :  { %v192_v48 = vpop.f32.mrb[0].mxu1 }
 0x1a5   :  { %v182_v49 = vpop.f32.mrb[0].mxu0  ;;  %v194_v51 = vpop.f32.mrb[1].mxu1 }
 0x1a6   :  { %v184_v52 = vpop.f32.mrb[1].mxu0  ;;  %v267_v53 = vpack.c.bf16 %v194_v51, %v192_v48  ;;  %v196_v54 = vpop.f32.mrb[2].mxu1 }
 0x1a7   :  { %v265_v55 = vpack.c.bf16 %v184_v52, %v182_v49  ;;  %v186_v56 = vpop.f32.mrb[2].mxu0  ;;  %v198_v57 = vpop.f32.mrb[3].mxu1 }
 0x1a8   :  { %230 = vst.msk [vmem:[#allocation7 + $0x10] sm:$0xff] %vm440_vm3, %v267_v53  ;;  %v188_v58 = vpop.f32.mrb[3].mxu0  ;;  %v268_v59 = vpack.c.bf16 %v198_v57, %v196_v54 }
 0x1a9   :  { %228 = vst.msk [vmem:[#allocation7] sm:$0xff] %vm440_vm3, %v265_v55  ;;  %v266_v60 = vpack.c.bf16 %v188_v58, %v186_v56 }
 0x1aa   :  { %231 = vst.msk [vmem:[#allocation7 + $0x18] sm:$0xff] %vm440_vm3, %v268_v59 }
 0x1ab   :  { %229 = vst.msk [vmem:[#allocation7 + $0x8] sm:$0xff] %vm440_vm3, %v266_v60 }
 0x1ac   :  { %358 = shalt.err (!%p355_p6)
}
 0x1ad   :  { %s359_s15 = scalar_lea.hbm %s470_s3, 512 }
 0x1ae   :  { %p360_p7 = scmp.ne.s32.totalorder %s470_s3, %s359_s15  ;;  %p363_p8 = scmp.lt.u32.totalorder %s359_s15, %s470_s3 }
 0x1b0   :  { %p365_p9 = pnand %p363_p8, %p360_p7 }
 0x1b2   :  { %368 = shalt.err (!%p365_p9)
}
 0x1b3   :  { %243 = dma.vmem_to_hbm [thread:$0]  %s238_s11, 512, %s470_s3, [#allocation4], %s376_s22, %s376_s22, %s377_s23  }
 0x1b4   :  { %373 = dma.done.wait [#allocation4], 512  }
 0x1b5   :  { %374 = vsyncadd [#allocation4], 4294966784 }
 0x1b6   :  { %247 = vsyncpa [#allocation3], 1 }
 0x1b7   :  { %248 = vsyncpa [#allocation6], 1 }
 0x1b8   :  { %249 = vsyncpa [#allocation4], 1 }

</bundles_post_ra>
